<compile_context>
chip_gen: v7x
topology: tpu7x:2x2x1
jax: 0.10.0
libtpu: 0.0.40
codegen_flags: <defaults>
</compile_context>

<pallas_src>
import math

import jax
import jax.numpy as jnp
from jax.experimental import pallas as pl
from jax.experimental.pallas import tpu as pltpu

# Row layout of the per-block (8, H) constant stack.
_ROW_B, _ROW_GAMMA, _ROW_BETA, _ROW_BP, _ROW_BR = 0, 1, 2, 3, 4
_LANE = 128
_SUBLANE = 8


def _round_up(x, m):
    return ((x + m - 1) // m) * m


# ----------------------------------------------------------------------------
# Fused kernel (built per network topology; 1-D grid over the batch)
# ----------------------------------------------------------------------------
def _make_fused_kernel(hidden_dims, out_rows, out_bias_row):
    """Per hidden block the refs are either
         (w, w_pr, vecs)   if H % 128 == 0  (fused TauR matmul, aligned split)
         (w, wp, wr, vecs) otherwise        (two separate TauR matmuls)
       followed by a single out_wb ref holding [out_w ; zeros ; out_b row]."""
    fused_flags = tuple(h % _LANE == 0 for h in hidden_dims)

    def kernel(*refs):
        x_ref = refs[0]
        o_ref = refs[-1]
        cur = x_ref[...].astype(jnp.float32)                  # (TILE_B, Din)

        idx = 1
        for bi, H in enumerate(hidden_dims):
            w_ref = refs[idx]
            idx += 1
            if fused_flags[bi]:
                wpr_ref = refs[idx]
                idx += 1
                wp_ref = wr_ref = None
            else:
                wp_ref, wr_ref = refs[idx], refs[idx + 1]
                idx += 2
                wpr_ref = None
            vec_ref = refs[idx]
            idx += 1

            vecs = vec_ref[...]                               # (8, H), f32
            b_lin = vecs[_ROW_B:_ROW_B + 1, :]
            gamma = vecs[_ROW_GAMMA:_ROW_GAMMA + 1, :]
            beta = vecs[_ROW_BETA:_ROW_BETA + 1, :]
            bp = vecs[_ROW_BP:_ROW_BP + 1, :]
            br = vecs[_ROW_BR:_ROW_BR + 1, :]

            # ---- Linear (MXU in weight dtype, f32 accumulate) ----
            h = jnp.dot(cur.astype(w_ref.dtype), w_ref[...],
                        preferred_element_type=jnp.float32) + b_lin

            # ---- LayerNorm (eps=1e-5); reuse the centered tensor ----
            mean = jnp.mean(h, axis=-1, keepdims=True)
            d = h - mean
            var = jnp.mean(d * d, axis=-1, keepdims=True)
            h = d * jax.lax.rsqrt(var + 1e-5) * gamma + beta

            # ---- ReLU ----
            h = jnp.maximum(h, 0.0)

            # ---- TauRLayer ----
            hm = h.astype(w_ref.dtype)
            if fused_flags[bi]:
                pr = jnp.dot(hm, wpr_ref[...],
                             preferred_element_type=jnp.float32)   # (B, 2H)
                prog_lin, risk_lin = pr[:, :H], pr[:, H:]
            else:
                prog_lin = jnp.dot(hm, wp_ref[...],
                                   preferred_element_type=jnp.float32)
                risk_lin = jnp.dot(hm, wr_ref[...],
                                   preferred_element_type=jnp.float32)
            progress = jnp.tanh(prog_lin + bp)
            risk = jnp.maximum(risk_lin + br, 0.0)
            numerator = progress + 0.1                             # alpha
            denominator = jnp.maximum(risk + 0.1 + 1e-6, 1e-5)     # beta+eps
            # EUP already does 2x tanh + rsqrt per element per block, so keep
            # the divide on the VALU (4 slots, has slack). tanh is bounded in
            # [-1, 1], so the PyTorch clamp(-10, 10) afterwards is a no-op.
            cur = jnp.tanh(numerator / denominator)

        # ---- Output Linear; bias folded into the same ref ----
        out_wb_ref = refs[idx]
        w_out = out_wb_ref[:out_rows, :]
        b_out = out_wb_ref[out_bias_row:out_bias_row + 1, :].astype(jnp.float32)
        o_ref[...] = (jnp.dot(cur.astype(out_wb_ref.dtype), w_out,
                              preferred_element_type=jnp.float32)
                      + b_out).astype(o_ref.dtype)

    return kernel


# ----------------------------------------------------------------------------
# pallas_call wrapper
# ----------------------------------------------------------------------------
def integrated_evolving_network_forward(params, x, *, tile_b=512):
    hidden_dims = params["hidden_dims"]
    output_dim = params["output_dim"]
    out_wb = params["out_wb"]
    o_pad = out_wb.shape[1]

    B, Din = x.shape
    tile_b = max(_SUBLANE, _round_up(tile_b, _SUBLANE))
    TILE_B = min(tile_b, max(_SUBLANE, _round_up(B, _SUBLANE)))
    B_pad = _round_up(max(B, TILE_B), TILE_B)
    # Padding rows stay finite through LayerNorm and are sliced off below.
    x_in = x if B_pad == B else jnp.zeros((B_pad, Din), x.dtype).at[:B, :].set(x)

    flat_inputs = [x_in]
    for blk in params["blocks"]:
        flat_inputs.extend(blk)
    flat_inputs.append(out_wb)

    def resident(arr):  # VMEM-resident across all batch tiles
        return pl.BlockSpec(arr.shape, lambda i: (0,) * arr.ndim)

    in_specs = [pl.BlockSpec((TILE_B, Din), lambda i: (i, 0))]
    in_specs += [resident(a) for a in flat_inputs[1:]]
    out_specs = pl.BlockSpec((TILE_B, o_pad), lambda i: (i, 0))

    # Explicit VMEM budget: resident weights (x2 for pipeline buffering) +
    # double-buffered x/out tiles + live activation slabs. v5e's default
    # scoped limit is only 16 MiB; compute what we actually need.
    param_bytes = sum(int(a.size) * a.dtype.itemsize for a in flat_inputs[1:])
    widest = max([Din, o_pad] + [2 * h for h in hidden_dims]) if hidden_dims \
        else max(Din, o_pad)
    act_bytes = 8 * TILE_B * widest * 4
    io_bytes = 2 * TILE_B * (Din * x.dtype.itemsize + o_pad * 4)
    vmem_limit = int(min(100 * 2**20,
                         2 * param_bytes + act_bytes + io_bytes + 2 * 2**20))
    # TODO(synk): if 2*param_bytes alone exceeds ~48 MiB (v7x has only 64 MiB
    # physical VMEM) the per-block weights should be left in HBM
    # (memory_space=pl.ANY) and streamed with pltpu.make_async_copy instead of
    # being kept fully resident; not needed at these shapes.

    out = pl.pallas_call(
        _make_fused_kernel(tuple(hidden_dims), params["out_rows"],
                           params["out_bias_row"]),
        grid=(B_pad // TILE_B,),
        out_shape=jax.ShapeDtypeStruct((B_pad, o_pad), jnp.float32),
        in_specs=in_specs,
        out_specs=out_specs,
        compiler_params=pltpu.CompilerParams(
            dimension_semantics=("parallel",),
            vmem_limit_bytes=vmem_limit),
    )(*flat_inputs)
    return out[:B, :output_dim]


# ----------------------------------------------------------------------------
# Parameter init (mirrors the module's __init__ shapes / init schemes)
# ----------------------------------------------------------------------------
def _xavier_uniform(key, fan_in, fan_out, gain=1.0):
    bound = gain * math.sqrt(6.0 / (fan_in + fan_out))
    return jax.random.uniform(key, (fan_in, fan_out), jnp.float32, -bound, bound)


def _linear_default(key, fan_in, fan_out):
    # PyTorch default nn.Linear init bound.
    bound = math.sqrt(1.0 / fan_in)
    return jax.random.uniform(key, (fan_in, fan_out), jnp.float32, -bound, bound)


def init_network_params(key, input_dim, hidden_dims, output_dim,
                        matmul_dtype=jnp.float32):
    params = {"blocks": [], "hidden_dims": list(hidden_dims),
              "output_dim": output_dim}
    current = input_dim
    for h in hidden_dims:
        key, k_w, k_b, k_p, k_r = jax.random.split(key, 5)
        w = _linear_default(k_w, current, h)
        b = jax.random.uniform(k_b, (h,), jnp.float32,
                               -math.sqrt(1.0 / current),
                               math.sqrt(1.0 / current))
        gamma = jnp.ones((h,), jnp.float32)          # LayerNorm weight
        beta = jnp.zeros((h,), jnp.float32)          # LayerNorm bias
        wp = _xavier_uniform(k_p, h, h, gain=0.1)    # TauR progress_transform
        bp = jnp.zeros((h,), jnp.float32)
        wr = _xavier_uniform(k_r, h, h, gain=0.1)    # TauR risk_transform
        br = jnp.zeros((h,), jnp.float32)

        vecs = jnp.zeros((8, h), jnp.float32)
        vecs = vecs.at[_ROW_B].set(b).at[_ROW_GAMMA].set(gamma)
        vecs = vecs.at[_ROW_BETA].set(beta).at[_ROW_BP].set(bp)
        vecs = vecs.at[_ROW_BR].set(br)

        w = w.astype(matmul_dtype)
        wp = wp.astype(matmul_dtype)
        wr = wr.astype(matmul_dtype)
        if h % _LANE == 0:   # lane-aligned split -> safe to fuse the two dots
            params["blocks"].append((w, jnp.concatenate([wp, wr], axis=1), vecs))
        else:
            params["blocks"].append((w, wp, wr, vecs))
        current = h

    key, k_wo, k_bo = jax.random.split(key, 3)
    out_w = _linear_default(k_wo, current, output_dim)
    out_b = jax.random.uniform(k_bo, (output_dim,), jnp.float32,
                               -math.sqrt(1.0 / current),
                               math.sqrt(1.0 / current))
    o_pad = max(_LANE, _round_up(output_dim, _LANE))   # lane-dense output slab
    out_rows = current
    bias_row = _round_up(out_rows, _SUBLANE)
    out_wb = jnp.zeros((bias_row + _SUBLANE, o_pad), jnp.float32)
    out_wb = out_wb.at[:out_rows, :output_dim].set(out_w)
    out_wb = out_wb.at[bias_row, :output_dim].set(out_b)
    params["out_wb"] = out_wb.astype(matmul_dtype)
    params["out_rows"] = out_rows
    params["out_bias_row"] = bias_row
    return params


# ----------------------------------------------------------------------------
# Pure-JAX reference (matches IntegratedEvolvingNetwork.forward defaults)
# ----------------------------------------------------------------------------
# TODO(synk): use_dynamic_units=True path (DynamicMathUnit) and the host-side
#             structural-evolution methods are not kernelized; the module's
#             default forward (Linear->LN->ReLU->TauR blocks + output Linear)
#             is what is implemented.
def reference_forward(params, x):
    cur = x.astype(jnp.float32)
    for blk in params["blocks"]:
        if len(blk) == 3:
            w, w_pr, vecs = blk
            H = w.shape[1]
            wp, wr = w_pr[:, :H], w_pr[:, H:]
        else:
            w, wp, wr, vecs = blk
        b, gamma, beta = vecs[_ROW_B], vecs[_ROW_GAMMA], vecs[_ROW_BETA]
        bp, br = vecs[_ROW_BP], vecs[_ROW_BR]
        dt = w.dtype
        h = jnp.dot(cur.astype(dt), w, preferred_element_type=jnp.float32) + b
        mean = jnp.mean(h, axis=-1, keepdims=True)
        var = jnp.mean((h - mean) ** 2, axis=-1, keepdims=True)
        h = (h - mean) / jnp.sqrt(var + 1e-5) * gamma + beta
        h = jnp.maximum(h, 0.0)
        prog = jnp.tanh(jnp.dot(h.astype(dt), wp,
                                preferred_element_type=jnp.float32) + bp)
        risk = jnp.maximum(jnp.dot(h.astype(dt), wr,
                                   preferred_element_type=jnp.float32) + br, 0.0)
        cur = jnp.clip(jnp.tanh((prog + 0.1) /
                                jnp.maximum(risk + 0.1 + 1e-6, 1e-5)),
                       -10.0, 10.0)
    out_wb = params["out_wb"]
    O = params["output_dim"]
    w_out = out_wb[:params["out_rows"], :O]
    b_out = out_wb[params["out_bias_row"], :O].astype(jnp.float32)
    return jnp.dot(cur.astype(out_wb.dtype), w_out,
                   preferred_element_type=jnp.float32) + b_out


if __name__ == "__main__":
    input_dim, hidden_dims, output_dim = 16, [32, 32], 8

    key = jax.random.PRNGKey(0)
    key, k_x1, k_x2 = jax.random.split(key, 3)

    # ---- f32 params: exact check against the pure-JAX reference ----
    params_f32 = init_network_params(key, input_dim, hidden_dims, output_dim,
                                     matmul_dtype=jnp.float32)

    x_small = jax.random.normal(k_x1, (4, input_dim), jnp.float32)
    out = jax.block_until_ready(
        integrated_evolving_network_forward(params_f32, x_small))
    ref = reference_forward(params_f32, x_small)
    assert out.shape == (4, output_dim)
    assert jnp.allclose(out, ref, atol=1e-4, rtol=1e-4), \
        f"f32 max abs diff {jnp.max(jnp.abs(out - ref))}"

    # ---- Multi-tile batch grid (3 tiles of 16 rows, with batch padding) ----
    x_grid = jax.random.normal(k_x2, (40, input_dim), jnp.float32)
    out_g = jax.block_until_ready(
        integrated_evolving_network_forward(params_f32, x_grid, tile_b=16))
    ref_g = reference_forward(params_f32, x_grid)
    assert out_g.shape == (40, output_dim)
    assert jnp.allclose(out_g, ref_g, atol=1e-4, rtol=1e-4), \
        f"grid max abs diff {jnp.max(jnp.abs(out_g - ref_g))}"

    # ---- bf16 matmul operands (v6e/v7x MXU-native); reference uses the same
    #      bf16 weights so only accumulation-order noise remains ----
    params_bf16 = init_network_params(key, input_dim, hidden_dims, output_dim,
                                      matmul_dtype=jnp.bfloat16)
    out_b = jax.block_until_ready(
        integrated_evolving_network_forward(params_bf16, x_small))
    ref_b = reference_forward(params_bf16, x_small)
    assert jnp.allclose(out_b, ref_b, atol=2e-2, rtol=2e-2), \
        f"bf16 max abs diff {jnp.max(jnp.abs(out_b - ref_b))}"

    print("KERNEL_OK")
</pallas_src>

<mosaic_0001>
module attributes {stable_mosaic.version = 11 : i64} {
  func.func @kernel(%arg0: i32, %arg1: memref<8x16xf32, #tpu.memory_space<vmem>>, %arg2: memref<16x32xf32, #tpu.memory_space<vmem>>, %arg3: memref<32x32xf32, #tpu.memory_space<vmem>>, %arg4: memref<32x32xf32, #tpu.memory_space<vmem>>, %arg5: memref<8x32xf32, #tpu.memory_space<vmem>>, %arg6: memref<32x32xf32, #tpu.memory_space<vmem>>, %arg7: memref<32x32xf32, #tpu.memory_space<vmem>>, %arg8: memref<32x32xf32, #tpu.memory_space<vmem>>, %arg9: memref<8x32xf32, #tpu.memory_space<vmem>>, %arg10: memref<40x128xf32, #tpu.memory_space<vmem>>, %arg11: memref<8x128xf32, #tpu.memory_space<vmem>>) attributes {dimension_semantics = [#tpu.dimension_semantics<parallel>], iteration_bounds = array<i64: 1>, scalar_prefetch = 0 : i64, scratch_operands = 0 : i64, tpu.core_type = #tpu.core_type<tc>, window_params = [{transform_indices = @transform_0, window_bounds = array<i64: 8, 16>}, {pipeline_mode = #tpu.pipeline_mode<synchronous>, transform_indices = @transform_1, window_bounds = array<i64: 16, 32>}, {pipeline_mode = #tpu.pipeline_mode<synchronous>, transform_indices = @transform_2, window_bounds = array<i64: 32, 32>}, {pipeline_mode = #tpu.pipeline_mode<synchronous>, transform_indices = @transform_3, window_bounds = array<i64: 32, 32>}, {pipeline_mode = #tpu.pipeline_mode<synchronous>, transform_indices = @transform_4, window_bounds = array<i64: 8, 32>}, {pipeline_mode = #tpu.pipeline_mode<synchronous>, transform_indices = @transform_5, window_bounds = array<i64: 32, 32>}, {pipeline_mode = #tpu.pipeline_mode<synchronous>, transform_indices = @transform_6, window_bounds = array<i64: 32, 32>}, {pipeline_mode = #tpu.pipeline_mode<synchronous>, transform_indices = @transform_7, window_bounds = array<i64: 32, 32>}, {pipeline_mode = #tpu.pipeline_mode<synchronous>, transform_indices = @transform_8, window_bounds = array<i64: 8, 32>}, {pipeline_mode = #tpu.pipeline_mode<synchronous>, transform_indices = @transform_9, window_bounds = array<i64: 40, 128>}, {transform_indices = @transform_10, window_bounds = array<i64: 8, 128>}]} {
    %c0 = arith.constant 0 : index
    %c0_0 = arith.constant 0 : index
    %0 = vector.load %arg1[%c0, %c0_0] : memref<8x16xf32, #tpu.memory_space<vmem>>, vector<8x16xf32>
    %c0_1 = arith.constant 0 : index
    %c0_2 = arith.constant 0 : index
    %1 = vector.load %arg5[%c0_1, %c0_2] : memref<8x32xf32, #tpu.memory_space<vmem>>, vector<8x32xf32>
    %2 = vector.extract_strided_slice %1 {offsets = [0, 0], sizes = [1, 32], strides = [1, 1]} : vector<8x32xf32> to vector<1x32xf32>
    %3 = vector.extract_strided_slice %1 {offsets = [1, 0], sizes = [1, 32], strides = [1, 1]} : vector<8x32xf32> to vector<1x32xf32>
    %4 = vector.extract_strided_slice %1 {offsets = [2, 0], sizes = [1, 32], strides = [1, 1]} : vector<8x32xf32> to vector<1x32xf32>
    %5 = vector.extract_strided_slice %1 {offsets = [3, 0], sizes = [1, 32], strides = [1, 1]} : vector<8x32xf32> to vector<1x32xf32>
    %6 = vector.extract_strided_slice %1 {offsets = [4, 0], sizes = [1, 32], strides = [1, 1]} : vector<8x32xf32> to vector<1x32xf32>
    %c0_3 = arith.constant 0 : index
    %c0_4 = arith.constant 0 : index
    %7 = vector.load %arg2[%c0_3, %c0_4] : memref<16x32xf32, #tpu.memory_space<vmem>>, vector<16x32xf32>
    %cst = arith.constant dense<0.000000e+00> : vector<8x32xf32>
    %8 = tpu.matmul %0, %7, %cst {dimension_numbers = #tpu.dot_dimension_numbers<[1], [0], [0], [1], [0, 0, 1, 1], [], []>} : vector<8x16xf32>, vector<16x32xf32>, vector<8x32xf32> -> vector<8x32xf32>
    %9 = vector.broadcast %2 : vector<1x32xf32> to vector<8x32xf32>
    %10 = arith.addf %8, %9 : vector<8x32xf32>
    %cst_5 = arith.constant dense<0.000000e+00> : vector<8xf32>
    %11 = vector.multi_reduction <add>, %10, %cst_5 [1] : vector<8x32xf32> to vector<8xf32>
    %12 = vector.shape_cast %11 : vector<8xf32> to vector<8x1xf32>
    %cst_6 = arith.constant 3.200000e+01 : f32
    %13 = vector.broadcast %cst_6 : f32 to vector<8x1xf32>
    %14 = arith.divf %12, %13 : vector<8x1xf32>
    %15 = vector.broadcast %14 : vector<8x1xf32> to vector<8x32xf32>
    %16 = arith.subf %10, %15 : vector<8x32xf32>
    %17 = arith.mulf %16, %16 : vector<8x32xf32>
    %cst_7 = arith.constant dense<0.000000e+00> : vector<8xf32>
    %18 = vector.multi_reduction <add>, %17, %cst_7 [1] : vector<8x32xf32> to vector<8xf32>
    %19 = vector.shape_cast %18 : vector<8xf32> to vector<8x1xf32>
    %cst_8 = arith.constant 3.200000e+01 : f32
    %20 = vector.broadcast %cst_8 : f32 to vector<8x1xf32>
    %21 = arith.divf %19, %20 : vector<8x1xf32>
    %cst_9 = arith.constant 9.99999974E-6 : f32
    %22 = vector.broadcast %cst_9 : f32 to vector<8x1xf32>
    %23 = arith.addf %21, %22 : vector<8x1xf32>
    %24 = math.rsqrt %23 : vector<8x1xf32>
    %25 = vector.broadcast %24 : vector<8x1xf32> to vector<8x32xf32>
    %26 = arith.mulf %16, %25 : vector<8x32xf32>
    %27 = vector.broadcast %3 : vector<1x32xf32> to vector<8x32xf32>
    %28 = arith.mulf %26, %27 : vector<8x32xf32>
    %29 = vector.broadcast %4 : vector<1x32xf32> to vector<8x32xf32>
    %30 = arith.addf %28, %29 : vector<8x32xf32>
    %cst_10 = arith.constant 0.000000e+00 : f32
    %31 = vector.broadcast %cst_10 : f32 to vector<8x32xf32>
    %32 = arith.maximumf %30, %31 : vector<8x32xf32>
    %c0_11 = arith.constant 0 : index
    %c0_12 = arith.constant 0 : index
    %33 = vector.load %arg3[%c0_11, %c0_12] : memref<32x32xf32, #tpu.memory_space<vmem>>, vector<32x32xf32>
    %cst_13 = arith.constant dense<0.000000e+00> : vector<8x32xf32>
    %34 = tpu.matmul %32, %33, %cst_13 {dimension_numbers = #tpu.dot_dimension_numbers<[1], [0], [0], [1], [0, 0, 1, 1], [], []>} : vector<8x32xf32>, vector<32x32xf32>, vector<8x32xf32> -> vector<8x32xf32>
    %c0_14 = arith.constant 0 : index
    %c0_15 = arith.constant 0 : index
    %35 = vector.load %arg4[%c0_14, %c0_15] : memref<32x32xf32, #tpu.memory_space<vmem>>, vector<32x32xf32>
    %cst_16 = arith.constant dense<0.000000e+00> : vector<8x32xf32>
    %36 = tpu.matmul %32, %35, %cst_16 {dimension_numbers = #tpu.dot_dimension_numbers<[1], [0], [0], [1], [0, 0, 1, 1], [], []>} : vector<8x32xf32>, vector<32x32xf32>, vector<8x32xf32> -> vector<8x32xf32>
    %37 = vector.broadcast %5 : vector<1x32xf32> to vector<8x32xf32>
    %38 = arith.addf %34, %37 : vector<8x32xf32>
    %39 = math.tanh %38 : vector<8x32xf32>
    %40 = vector.broadcast %6 : vector<1x32xf32> to vector<8x32xf32>
    %41 = arith.addf %36, %40 : vector<8x32xf32>
    %cst_17 = arith.constant 0.000000e+00 : f32
    %42 = vector.broadcast %cst_17 : f32 to vector<8x32xf32>
    %43 = arith.maximumf %41, %42 : vector<8x32xf32>
    %cst_18 = arith.constant 1.000000e-01 : f32
    %44 = vector.broadcast %cst_18 : f32 to vector<8x32xf32>
    %45 = arith.addf %39, %44 : vector<8x32xf32>
    %cst_19 = arith.constant 1.000000e-01 : f32
    %46 = vector.broadcast %cst_19 : f32 to vector<8x32xf32>
    %47 = arith.addf %43, %46 : vector<8x32xf32>
    %cst_20 = arith.constant 9.99999997E-7 : f32
    %48 = vector.broadcast %cst_20 : f32 to vector<8x32xf32>
    %49 = arith.addf %47, %48 : vector<8x32xf32>
    %cst_21 = arith.constant 9.99999974E-6 : f32
    %50 = vector.broadcast %cst_21 : f32 to vector<8x32xf32>
    %51 = arith.maximumf %49, %50 : vector<8x32xf32>
    %52 = arith.divf %45, %51 : vector<8x32xf32>
    %53 = math.tanh %52 : vector<8x32xf32>
    %c0_22 = arith.constant 0 : index
    %c0_23 = arith.constant 0 : index
    %54 = vector.load %arg9[%c0_22, %c0_23] : memref<8x32xf32, #tpu.memory_space<vmem>>, vector<8x32xf32>
    %55 = vector.extract_strided_slice %54 {offsets = [0, 0], sizes = [1, 32], strides = [1, 1]} : vector<8x32xf32> to vector<1x32xf32>
    %56 = vector.extract_strided_slice %54 {offsets = [1, 0], sizes = [1, 32], strides = [1, 1]} : vector<8x32xf32> to vector<1x32xf32>
    %57 = vector.extract_strided_slice %54 {offsets = [2, 0], sizes = [1, 32], strides = [1, 1]} : vector<8x32xf32> to vector<1x32xf32>
    %58 = vector.extract_strided_slice %54 {offsets = [3, 0], sizes = [1, 32], strides = [1, 1]} : vector<8x32xf32> to vector<1x32xf32>
    %59 = vector.extract_strided_slice %54 {offsets = [4, 0], sizes = [1, 32], strides = [1, 1]} : vector<8x32xf32> to vector<1x32xf32>
    %c0_24 = arith.constant 0 : index
    %c0_25 = arith.constant 0 : index
    %60 = vector.load %arg6[%c0_24, %c0_25] : memref<32x32xf32, #tpu.memory_space<vmem>>, vector<32x32xf32>
    %cst_26 = arith.constant dense<0.000000e+00> : vector<8x32xf32>
    %61 = tpu.matmul %53, %60, %cst_26 {dimension_numbers = #tpu.dot_dimension_numbers<[1], [0], [0], [1], [0, 0, 1, 1], [], []>} : vector<8x32xf32>, vector<32x32xf32>, vector<8x32xf32> -> vector<8x32xf32>
    %62 = vector.broadcast %55 : vector<1x32xf32> to vector<8x32xf32>
    %63 = arith.addf %61, %62 : vector<8x32xf32>
    %cst_27 = arith.constant dense<0.000000e+00> : vector<8xf32>
    %64 = vector.multi_reduction <add>, %63, %cst_27 [1] : vector<8x32xf32> to vector<8xf32>
    %65 = vector.shape_cast %64 : vector<8xf32> to vector<8x1xf32>
    %cst_28 = arith.constant 3.200000e+01 : f32
    %66 = vector.broadcast %cst_28 : f32 to vector<8x1xf32>
    %67 = arith.divf %65, %66 : vector<8x1xf32>
    %68 = vector.broadcast %67 : vector<8x1xf32> to vector<8x32xf32>
    %69 = arith.subf %63, %68 : vector<8x32xf32>
    %70 = arith.mulf %69, %69 : vector<8x32xf32>
    %cst_29 = arith.constant dense<0.000000e+00> : vector<8xf32>
    %71 = vector.multi_reduction <add>, %70, %cst_29 [1] : vector<8x32xf32> to vector<8xf32>
    %72 = vector.shape_cast %71 : vector<8xf32> to vector<8x1xf32>
    %cst_30 = arith.constant 3.200000e+01 : f32
    %73 = vector.broadcast %cst_30 : f32 to vector<8x1xf32>
    %74 = arith.divf %72, %73 : vector<8x1xf32>
    %cst_31 = arith.constant 9.99999974E-6 : f32
    %75 = vector.broadcast %cst_31 : f32 to vector<8x1xf32>
    %76 = arith.addf %74, %75 : vector<8x1xf32>
    %77 = math.rsqrt %76 : vector<8x1xf32>
    %78 = vector.broadcast %77 : vector<8x1xf32> to vector<8x32xf32>
    %79 = arith.mulf %69, %78 : vector<8x32xf32>
    %80 = vector.broadcast %56 : vector<1x32xf32> to vector<8x32xf32>
    %81 = arith.mulf %79, %80 : vector<8x32xf32>
    %82 = vector.broadcast %57 : vector<1x32xf32> to vector<8x32xf32>
    %83 = arith.addf %81, %82 : vector<8x32xf32>
    %cst_32 = arith.constant 0.000000e+00 : f32
    %84 = vector.broadcast %cst_32 : f32 to vector<8x32xf32>
    %85 = arith.maximumf %83, %84 : vector<8x32xf32>
    %c0_33 = arith.constant 0 : index
    %c0_34 = arith.constant 0 : index
    %86 = vector.load %arg7[%c0_33, %c0_34] : memref<32x32xf32, #tpu.memory_space<vmem>>, vector<32x32xf32>
    %cst_35 = arith.constant dense<0.000000e+00> : vector<8x32xf32>
    %87 = tpu.matmul %85, %86, %cst_35 {dimension_numbers = #tpu.dot_dimension_numbers<[1], [0], [0], [1], [0, 0, 1, 1], [], []>} : vector<8x32xf32>, vector<32x32xf32>, vector<8x32xf32> -> vector<8x32xf32>
    %c0_36 = arith.constant 0 : index
    %c0_37 = arith.constant 0 : index
    %88 = vector.load %arg8[%c0_36, %c0_37] : memref<32x32xf32, #tpu.memory_space<vmem>>, vector<32x32xf32>
    %cst_38 = arith.constant dense<0.000000e+00> : vector<8x32xf32>
    %89 = tpu.matmul %85, %88, %cst_38 {dimension_numbers = #tpu.dot_dimension_numbers<[1], [0], [0], [1], [0, 0, 1, 1], [], []>} : vector<8x32xf32>, vector<32x32xf32>, vector<8x32xf32> -> vector<8x32xf32>
    %90 = vector.broadcast %58 : vector<1x32xf32> to vector<8x32xf32>
    %91 = arith.addf %87, %90 : vector<8x32xf32>
    %92 = math.tanh %91 : vector<8x32xf32>
    %93 = vector.broadcast %59 : vector<1x32xf32> to vector<8x32xf32>
    %94 = arith.addf %89, %93 : vector<8x32xf32>
    %cst_39 = arith.constant 0.000000e+00 : f32
    %95 = vector.broadcast %cst_39 : f32 to vector<8x32xf32>
    %96 = arith.maximumf %94, %95 : vector<8x32xf32>
    %cst_40 = arith.constant 1.000000e-01 : f32
    %97 = vector.broadcast %cst_40 : f32 to vector<8x32xf32>
    %98 = arith.addf %92, %97 : vector<8x32xf32>
    %cst_41 = arith.constant 1.000000e-01 : f32
    %99 = vector.broadcast %cst_41 : f32 to vector<8x32xf32>
    %100 = arith.addf %96, %99 : vector<8x32xf32>
    %cst_42 = arith.constant 9.99999997E-7 : f32
    %101 = vector.broadcast %cst_42 : f32 to vector<8x32xf32>
    %102 = arith.addf %100, %101 : vector<8x32xf32>
    %cst_43 = arith.constant 9.99999974E-6 : f32
    %103 = vector.broadcast %cst_43 : f32 to vector<8x32xf32>
    %104 = arith.maximumf %102, %103 : vector<8x32xf32>
    %105 = arith.divf %98, %104 : vector<8x32xf32>
    %106 = math.tanh %105 : vector<8x32xf32>
    %c0_44 = arith.constant 0 : index
    %c0_45 = arith.constant 0 : index
    %107 = vector.load %arg10[%c0_44, %c0_45] : memref<40x128xf32, #tpu.memory_space<vmem>>, vector<32x128xf32>
    %c32 = arith.constant 32 : index
    %c0_46 = arith.constant 0 : index
    %108 = vector.load %arg10[%c32, %c0_46] : memref<40x128xf32, #tpu.memory_space<vmem>>, vector<1x128xf32>
    %cst_47 = arith.constant dense<0.000000e+00> : vector<8x128xf32>
    %109 = tpu.matmul %106, %107, %cst_47 {dimension_numbers = #tpu.dot_dimension_numbers<[1], [0], [0], [1], [0, 0, 1, 1], [], []>} : vector<8x32xf32>, vector<32x128xf32>, vector<8x128xf32> -> vector<8x128xf32>
    %110 = vector.broadcast %108 : vector<1x128xf32> to vector<8x128xf32>
    %111 = arith.addf %109, %110 : vector<8x128xf32>
    %c0_48 = arith.constant 0 : index
    %c0_49 = arith.constant 0 : index
    %112 = vector.load %arg11[%c0_48, %c0_49] : memref<8x128xf32, #tpu.memory_space<vmem>>, vector<8x128xf32>
    tpu.vector_store %arg11[%c0_48, %c0_49], %111 {strides = array<i32>} : memref<8x128xf32, #tpu.memory_space<vmem>>, vector<8x128xf32>,
    return
  }
  func.func @transform_0(%arg0: i32) -> (i32, i32) {
    %c0_i32 = arith.constant 0 : i32
    %c0_i32_0 = arith.constant 0 : i32
    return %arg0, %c0_i32 : i32, i32
  }
  func.func @transform_1(%arg0: i32) -> (i32, i32) {
    %c0_i32 = arith.constant 0 : i32
    %c0_i32_0 = arith.constant 0 : i32
    %c0_i32_1 = arith.constant 0 : i32
    return %c0_i32, %c0_i32_0 : i32, i32
  }
  func.func @transform_2(%arg0: i32) -> (i32, i32) {
    %c0_i32 = arith.constant 0 : i32
    %c0_i32_0 = arith.constant 0 : i32
    %c0_i32_1 = arith.constant 0 : i32
    return %c0_i32, %c0_i32_0 : i32, i32
  }
  func.func @transform_3(%arg0: i32) -> (i32, i32) {
    %c0_i32 = arith.constant 0 : i32
    %c0_i32_0 = arith.constant 0 : i32
    %c0_i32_1 = arith.constant 0 : i32
    return %c0_i32, %c0_i32_0 : i32, i32
  }
  func.func @transform_4(%arg0: i32) -> (i32, i32) {
    %c0_i32 = arith.constant 0 : i32
    %c0_i32_0 = arith.constant 0 : i32
    %c0_i32_1 = arith.constant 0 : i32
    return %c0_i32, %c0_i32_0 : i32, i32
  }
  func.func @transform_5(%arg0: i32) -> (i32, i32) {
    %c0_i32 = arith.constant 0 : i32
    %c0_i32_0 = arith.constant 0 : i32
    %c0_i32_1 = arith.constant 0 : i32
    return %c0_i32, %c0_i32_0 : i32, i32
  }
  func.func @transform_6(%arg0: i32) -> (i32, i32) {
    %c0_i32 = arith.constant 0 : i32
    %c0_i32_0 = arith.constant 0 : i32
    %c0_i32_1 = arith.constant 0 : i32
    return %c0_i32, %c0_i32_0 : i32, i32
  }
  func.func @transform_7(%arg0: i32) -> (i32, i32) {
    %c0_i32 = arith.constant 0 : i32
    %c0_i32_0 = arith.constant 0 : i32
    %c0_i32_1 = arith.constant 0 : i32
    return %c0_i32, %c0_i32_0 : i32, i32
  }
  func.func @transform_8(%arg0: i32) -> (i32, i32) {
    %c0_i32 = arith.constant 0 : i32
    %c0_i32_0 = arith.constant 0 : i32
    %c0_i32_1 = arith.constant 0 : i32
    return %c0_i32, %c0_i32_0 : i32, i32
  }
  func.func @transform_9(%arg0: i32) -> (i32, i32) {
    %c0_i32 = arith.constant 0 : i32
    %c0_i32_0 = arith.constant 0 : i32
    %c0_i32_1 = arith.constant 0 : i32
    return %c0_i32, %c0_i32_0 : i32, i32
  }
  func.func @transform_10(%arg0: i32) -> (i32, i32) {
    %c0_i32 = arith.constant 0 : i32
    %c0_i32_0 = arith.constant 0 : i32
    return %arg0, %c0_i32 : i32, i32
  }
}

</mosaic_0001>

<bundles_post_ra>
// kernel: tpu_custom_call.1
= control target key start
LH: loop header
LB: loop body
LE: loop exit
PB: predicated region body
PF: predicated region fallthrough
CT: control target
= control target key end

     0   :  { %15 = vsyncpa [#allocation3], 0  ;;  %s1463_s0 = inlined_call_operand.hbm [shape: f32[8,16], index: 0, kind: input, shape index: {}]   ;;  %s1464_s1 = inlined_call_operand.hbm [shape: f32[16,32], index: 1, kind: input, shape index: {}]   ;;  %s1465_s2 = inlined_call_operand.hbm [shape: f32[32,32], index: 2, kind: input, shape index: {}]   ;;  %s1466_s3 = inlined_call_operand.hbm [shape: f32[32,32], index: 3, kind: input, shape index: {}]   ;;  %s1467_s4 = inlined_call_operand.vmem [shape: f32[8,32], index: 4, kind: input, shape index: {}]   ;;  %s1468_s5 = inlined_call_operand.hbm [shape: f32[32,32], index: 5, kind: input, shape index: {}]   ;;  %s1469_s6 = inlined_call_operand.hbm [shape: f32[32,32], index: 6, kind: input, shape index: {}]   ;;  %s1470_s7 = inlined_call_operand.hbm [shape: f32[32,32], index: 7, kind: input, shape index: {}]   ;;  %s1471_s8 = inlined_call_operand.vmem [shape: f32[8,32], index: 8, kind: input, shape index: {}]   ;;  %s1472_s9 = inlined_call_operand.hbm [shape: f32[40,128], index: 9, kind: input, shape index: {}]   ;;  %s1473_s10 = inlined_call_operand.hbm [shape: f32[8,128], index: 10, kind: output, shape index: {}]  }
   0x1   :  { %16 = vsyncpa [#allocation6], 0 }
   0x2   :  { %17 = vsyncpa [#allocation9], 0 }
   0x3   :  { %18 = vsyncpa [#allocation12], 0 }
   0x4   :  { %19 = vsyncpa [#allocation15], 0 }
   0x5   :  { %20 = vsyncpa [#allocation4], 0  ;;  %s1188_s13 = smov [#allocation5]   ;;  %s978_s17 = scalar_lea.hbm %s1464_s1, 256 }
   0x6   :  { %s36_s14 = sshll.u32 %s1188_s13, 4  ;;  %p979_p0 = scmp.ne.s32.totalorder %s1464_s1, %s978_s17  ;;  %s37_s14 = int_to_ptr.vmem [resolvable:$true] %s36_s14 }
   0x7   :  { %p982_p1 = scmp.lt.u32.totalorder %s978_s17, %s1464_s1 }
   0x9   :  { %p984_p2 = pnand %p982_p1, %p979_p0 }
   0xb   :  { %987 = shalt.err (!%p984_p2)
}
   0xc   :  { %s988_s22 = scalar_lea.vmem %s37_s14, 256  ;;  %p993_p4 = scmp.lt.s32.totalorder %s37_s14, %s37_s14 }
   0xd   :  { %p989_p3 = scmp.ne.s32.totalorder %s37_s14, %s988_s22  ;;  %p994_p5 = scmp.lt.s32.totalorder %s988_s22, %s988_s22 }
   0xf   :  { %p995_p6 = por %p994_p5, %p993_p4 }
  0x11   :  { %p996_p7 = pnand %p995_p6, %p989_p3 }
  0x13   :  { %999 = shalt.err (!%p996_p7)
}
  0x14   :  { %s1189_s23 = smov 128   ;;  %s1190_s24 = smov 8  }
  0x15   :  { %42 = dma.hbm_to_vmem [thread:$0]  %s1464_s1, 256, %s37_s14, [#allocation6], %s1189_s23, %s1189_s23, %s1190_s24  }
  0x16   :  { %s1191_s27 = smov [#allocation8]   ;;  %s1192_s29 = smov [#allocation11]  }
  0x17   :  { %s60_s28 = sshll.u32 %s1191_s27, 4  ;;  %s86_s30 = sshll.u32 %s1192_s29, 4  ;;  %s61_s28 = int_to_ptr.vmem [resolvable:$true] %s60_s28  ;;  %s87_s30 = int_to_ptr.vmem [resolvable:$true] %s86_s30 }
  0x18   :  { %s1000_s13 = scalar_lea.hbm %s1466_s3, 512 }
  0x19   :  { %p1001_p8 = scmp.ne.s32.totalorder %s1466_s3, %s1000_s13  ;;  %p1004_p9 = scmp.lt.u32.totalorder %s1000_s13, %s1466_s3 }
  0x1b   :  { %p1006_p10 = pnand %p1004_p9, %p1001_p8 }
  0x1d   :  { %1009 = shalt.err (!%p1006_p10)
}
  0x1e   :  { %s1010_s1 = scalar_lea.vmem %s61_s28, 512  ;;  %p1015_p12 = scmp.lt.s32.totalorder %s61_s28, %s61_s28 }
  0x1f   :  { %p1011_p11 = scmp.ne.s32.totalorder %s61_s28, %s1010_s1  ;;  %p1016_p13 = scmp.lt.s32.totalorder %s1010_s1, %s1010_s1 }
  0x21   :  { %p1017_p0 = por %p1016_p13, %p1015_p12 }
  0x23   :  { %p1018_p1 = pnand %p1017_p0, %p1011_p11 }
  0x25   :  { %1021 = shalt.err (!%p1018_p1)
}
  0x26   :  { %66 = dma.hbm_to_vmem [thread:$0]  %s1466_s3, 512, %s61_s28, [#allocation9], %s1189_s23, %s1189_s23, %s1190_s24  }
  0x27   :  { %s1022_s22 = scalar_lea.hbm %s1469_s6, 512 }
  0x28   :  { %p1023_p2 = scmp.ne.s32.totalorder %s1469_s6, %s1022_s22  ;;  %p1026_p3 = scmp.lt.u32.totalorder %s1022_s22, %s1469_s6 }
  0x2a   :  { %p1028_p4 = pnand %p1026_p3, %p1023_p2 }
  0x2c   :  { %1031 = shalt.err (!%p1028_p4)
}
  0x2d   :  { %s1032_s11 = scalar_lea.vmem %s87_s30, 512  ;;  %p1037_p6 = scmp.lt.s32.totalorder %s87_s30, %s87_s30 }
  0x2e   :  { %p1033_p5 = scmp.ne.s32.totalorder %s87_s30, %s1032_s11  ;;  %p1038_p7 = scmp.lt.s32.totalorder %s1032_s11, %s1032_s11 }
  0x30   :  { %p1039_p8 = por %p1038_p7, %p1037_p6 }
  0x32   :  { %p1040_p9 = pnand %p1039_p8, %p1033_p5 }
  0x34   :  { %1043 = shalt.err (!%p1040_p9)
}
  0x35   :  { %92 = dma.hbm_to_vmem [thread:$0]  %s1469_s6, 512, %s87_s30, [#allocation12], %s1189_s23, %s1189_s23, %s1190_s24  }
  0x36   :  { %s1193_s12 = smov [#allocation2]   ;;  %s1194_s15 = smov [#allocation7]  }
  0x37   :  { %s27_s13 = sshll.u32 %s1193_s12, 4  ;;  %s48_s16 = sshll.u32 %s1194_s15, 4  ;;  %s28_s13 = int_to_ptr.vmem [resolvable:$true] %s27_s13  ;;  %s49_s16 = int_to_ptr.vmem [resolvable:$true] %s48_s16 }
  0x38   :  { %s1044_s1 = scalar_lea.hbm %s1463_s0, 128 }
  0x39   :  { %p1045_p10 = scmp.ne.s32.totalorder %s1463_s0, %s1044_s1  ;;  %p1048_p11 = scmp.lt.u32.totalorder %s1044_s1, %s1463_s0 }
  0x3b   :  { %p1050_p12 = pnand %p1048_p11, %p1045_p10 }
  0x3d   :  { %1053 = shalt.err (!%p1050_p12)
}
  0x3e   :  { %s1054_s6 = scalar_lea.vmem %s28_s13, 128  ;;  %p1059_p0 = scmp.lt.s32.totalorder %s28_s13, %s28_s13 }
  0x3f   :  { %p1055_p13 = scmp.ne.s32.totalorder %s28_s13, %s1054_s6  ;;  %p1060_p1 = scmp.lt.s32.totalorder %s1054_s6, %s1054_s6 }
  0x41   :  { %p1061_p2 = por %p1060_p1, %p1059_p0 }
  0x43   :  { %p1062_p3 = pnand %p1061_p2, %p1055_p13 }
  0x45   :  { %1065 = shalt.err (!%p1062_p3)
}
  0x46   :  { %30 = dma.hbm_to_vmem [thread:$0]  %s1463_s0, 128, %s28_s13, [#allocation3]  }
  0x47   :  { %s1066_s27 = scalar_lea.hbm %s1465_s2, 512 }
  0x48   :  { %p1067_p4 = scmp.ne.s32.totalorder %s1465_s2, %s1066_s27  ;;  %p1070_p5 = scmp.lt.u32.totalorder %s1066_s27, %s1465_s2 }
  0x4a   :  { %p1072_p6 = pnand %p1070_p5, %p1067_p4 }
  0x4c   :  { %1075 = shalt.err (!%p1072_p6)
}
  0x4d   :  { %s1076_s12 = scalar_lea.vmem %s49_s16, 512  ;;  %p1081_p8 = scmp.lt.s32.totalorder %s49_s16, %s49_s16 }
  0x4e   :  { %p1077_p7 = scmp.ne.s32.totalorder %s49_s16, %s1076_s12  ;;  %p1082_p9 = scmp.lt.s32.totalorder %s1076_s12, %s1076_s12 }
  0x50   :  { %p1083_p10 = por %p1082_p9, %p1081_p8 }
  0x52   :  { %p1084_p11 = pnand %p1083_p10, %p1077_p7 }
  0x54   :  { %1087 = shalt.err (!%p1084_p11)
}
  0x55   :  { %54 = dma.hbm_to_vmem [thread:$0]  %s1465_s2, 512, %s49_s16, [#allocation6], %s1189_s23, %s1189_s23, %s1190_s24  }
  0x56   :  { %s1195_s15 = smov [#allocation10]   ;;  %s1196_s18 = smov [#allocation13]  }
  0x57   :  { %s74_s17 = sshll.u32 %s1195_s15, 4  ;;  %s98_s1 = sshll.u32 %s1196_s18, 4  ;;  %s75_s17 = int_to_ptr.vmem [resolvable:$true] %s74_s17  ;;  %s99_s1 = int_to_ptr.vmem [resolvable:$true] %s98_s1 }
  0x58   :  { %s1088_s20 = scalar_lea.hbm %s1468_s5, 512 }
  0x59   :  { %p1089_p12 = scmp.ne.s32.totalorder %s1468_s5, %s1088_s20  ;;  %p1092_p13 = scmp.lt.u32.totalorder %s1088_s20, %s1468_s5 }
  0x5b   :  { %p1094_p0 = pnand %p1092_p13, %p1089_p12 }
  0x5d   :  { %1097 = shalt.err (!%p1094_p0)
}
  0x5e   :  { %s1098_s2 = scalar_lea.vmem %s75_s17, 512  ;;  %p1103_p2 = scmp.lt.s32.totalorder %s75_s17, %s75_s17 }
  0x5f   :  { %p1099_p1 = scmp.ne.s32.totalorder %s75_s17, %s1098_s2  ;;  %p1104_p3 = scmp.lt.s32.totalorder %s1098_s2, %s1098_s2 }
  0x61   :  { %p1105_p4 = por %p1104_p3, %p1103_p2 }
  0x63   :  { %p1106_p5 = pnand %p1105_p4, %p1099_p1 }
  0x65   :  { %1109 = shalt.err (!%p1106_p5)
}
  0x66   :  { %80 = dma.hbm_to_vmem [thread:$0]  %s1468_s5, 512, %s75_s17, [#allocation9], %s1189_s23, %s1189_s23, %s1190_s24  }
  0x67   :  { %s1110_s29 = scalar_lea.hbm %s1470_s7, 512 }
  0x68   :  { %p1111_p6 = scmp.ne.s32.totalorder %s1470_s7, %s1110_s29  ;;  %p1114_p7 = scmp.lt.u32.totalorder %s1110_s29, %s1470_s7 }
  0x6a   :  { %p1116_p8 = pnand %p1114_p7, %p1111_p6 }
  0x6c   :  { %1119 = shalt.err (!%p1116_p8)
}
  0x6d   :  { %s1120_s0 = scalar_lea.vmem %s99_s1, 512  ;;  %p1125_p10 = scmp.lt.s32.totalorder %s99_s1, %s99_s1 }
  0x6e   :  { %p1121_p9 = scmp.ne.s32.totalorder %s99_s1, %s1120_s0  ;;  %p1126_p11 = scmp.lt.s32.totalorder %s1120_s0, %s1120_s0 }
  0x70   :  { %p1127_p12 = por %p1126_p11, %p1125_p10 }
  0x72   :  { %p1128_p13 = pnand %p1127_p12, %p1121_p9 }
  0x74   :  { %1131 = shalt.err (!%p1128_p13)
}
  0x75   :  { %104 = dma.hbm_to_vmem [thread:$0]  %s1470_s7, 512, %s99_s1, [#allocation12], %s1189_s23, %s1189_s23, %s1190_s24  }
  0x76   :  { %s1197_s15 = smov [#allocation14]   ;;  %s1132_s19 = scalar_lea.hbm %s1472_s9, 640 }
  0x77   :  { %s112_s17 = sshll.u32 %s1197_s15, 4  ;;  %p1133_p0 = scmp.ne.s32.totalorder %s1472_s9, %s1132_s19  ;;  %s113_s17 = int_to_ptr.vmem [resolvable:$true] %s112_s17 }
  0x78   :  { %p1136_p1 = scmp.lt.u32.totalorder %s1132_s19, %s1472_s9 }
  0x7a   :  { %p1138_p2 = pnand %p1136_p1, %p1133_p0 }
  0x7c   :  { %1141 = shalt.err (!%p1138_p2)
}
  0x7d   :  { %s1142_s22 = scalar_lea.vmem %s113_s17, 640  ;;  %p1147_p4 = scmp.lt.s32.totalorder %s113_s17, %s113_s17 }
  0x7e   :  { %p1143_p3 = scmp.ne.s32.totalorder %s113_s17, %s1142_s22  ;;  %p1148_p5 = scmp.lt.s32.totalorder %s1142_s22, %s1142_s22 }
  0x80   :  { %p1149_p6 = por %p1148_p5, %p1147_p4 }
  0x82   :  { %p1150_p7 = pnand %p1149_p6, %p1143_p3 }
  0x84   :  { %1153 = shalt.err (!%p1150_p7)
}
  0x85   :  { %118 = dma.hbm_to_vmem [thread:$0]  %s1472_s9, 640, %s113_s17, [#allocation15], %s1189_s23, %s1189_s23, %s1190_s24  }
  0x86   :  { %1176 = dma.done.wait [#allocation3], 128  }
  0x87   :  { %1177 = vsyncadd [#allocation3], 4294967168 }
  0x88   :  { %1178 = dma.done.wait [#allocation6], 768  }
  0x89   :  { %1179 = vsyncadd [#allocation6], 4294966528 }
  0x8a   :  { %1180 = dma.done.wait [#allocation9], 1024  }
  0x8b   :  { %1181 = vsyncadd [#allocation9], 4294966272 }
  0x8c   :  { %1182 = dma.done.wait [#allocation12], 1024  }
  0x8d   :  { %1183 = vsyncadd [#allocation12], 4294966272 }
  0x8e   :  { %1184 = dma.done.wait [#allocation15], 640  }
  0x8f   :  { %1185 = vsyncadd [#allocation15], 4294966656  ;;  %v1198_v0 = vmov 0.0|0.0   ;;  %vm1199_vm0 = vmmov 0   ;;  %v1200_v1 = vmov 0.0   ;;  %v145_v2 = vld [vmem:[#allocation5] sm:$0xff]  ;;  %v147_v6 = vlaneseq }
  0x90   :  { %909 = vmatprep.subr.bf16.mxu0 %v1198_v0  ;;  %840 = vmatprep.mubr.msk.f32.mxu0 %vm1199_vm0, %v1200_v1  ;;  %v146_v3 = vld [vmem:[#allocation5 + $0x8] sm:$0xff]  ;;  %v143_v5 = vld [vmem:[#allocation2] sm:$0xff]  ;;  %vm151_vm1 = vcmask 130048   ;;  %vm225_vm2 = vcmask 261120   ;;  %v251_v20 = vld [vmem:[#allocation7] sm:$0xff] }
  0x91   :  { %912 = vmatprep.subr.bf16.mxu1 %v1198_v0  ;;  %851 = vmatprep.mubr.msk.f32.mxu1 %vm1199_vm0, %v1200_v1  ;;  %v910_v4 = vpack.c.bf16 %v146_v3, %v145_v2  ;;  %v1383_v7 = vshrl.u32 %v147_v6, 7  ;;  %v1389_v9 = vld [vmem:[%s1467_s4] sm:$0xff]  ;;  %v255_v22 = vld [vmem:[#allocation8] sm:$0xff]  ;;  %v253_v26 = vld [vmem:[#allocation7 + $0x10] sm:$0xff] }
  0x92   :  { %v252_v21 = vld [vmem:[#allocation7 + $0x8] sm:$0xff]  ;;  %v254_v27 = vld [vmem:[#allocation7 + $0x18] sm:$0xff]  ;;  %v257_v28 = vld [vmem:[#allocation8 + $0x10] sm:$0xff] }
  0x93   :  { %911 = vmatpush3.bf16.msra.mxu0 %v910_v4  ;;  %v149_v8 = vsub.s32 0, %v1383_v7  ;;  %v913_v23 = vpack.c.bf16 %v252_v21, %v251_v20  ;;  %v256_v24 = vld [vmem:[#allocation8 + $0x8] sm:$0xff]  ;;  %v916_v29 = vpack.c.bf16 %v254_v27, %v253_v26  ;;  %v258_v30 = vld [vmem:[#allocation8 + $0x18] sm:$0xff]  ;;  %v242_v35 = vsub.s32 1, %v1383_v7  ;;  %v420_v44 = vld [vmem:[#allocation10] sm:$0xff] }
  0x94   :  { %918 = vmatprep.subr.bf16.mxu0 %v1198_v0  ;;  %v919_v25 = vpack.c.bf16 %v256_v24, %v255_v22  ;;  %v922_v31 = vpack.c.bf16 %v258_v30, %v257_v28  ;;  %v247_v36 = vsub.s32 2, %v1383_v7  ;;  %v421_v45 = vld [vmem:[#allocation10 + $0x8] sm:$0xff]  ;;  %v422_v46 = vld [vmem:[#allocation10 + $0x10] sm:$0xff]  ;;  %v423_v48 = vld [vmem:[#allocation10 + $0x18] sm:$0xff]  ;;  %v339_v50 = vsub.s32 4, %v1383_v7 }
  0x95   :  { %v150_v10 = vrot.slane %v1389_v9, %v149_v8  ;;  %914 = vmatpush3.bf16.msra.mxu1 %v913_v23  ;;  %v243_v37 = vrot.slane %v1389_v9, %v242_v35  ;;  %v925_v47 = vpack.c.bf16 %v421_v45, %v420_v44  ;;  %v928_v49 = vpack.c.bf16 %v423_v48, %v422_v46  ;;  %v525_v20 = vld [vmem:[#allocation11] sm:$0xff]  ;;  %v526_v21 = vld [vmem:[#allocation11 + $0x8] sm:$0xff]  ;;  %v528_v26 = vld [vmem:[#allocation11 + $0x18] sm:$0xff] }
  0x96   :  { %841 = vmatmul.mubr.msk.f32.vlgmr.msra.gmra.mrb[0].mxu0 %vm151_vm1, %v143_v5  ;;  %915 = vmatprep.subr.bf16.mxu1 %v1198_v0  ;;  %v248_v40 = vrot.slane %v1389_v9, %v247_v36  ;;  %v261_v51 = vsub.s32 3, %v1383_v7  ;;  %v340_v52 = vrot.slane %v1389_v9, %v339_v50  ;;  %v529_v22 = vld [vmem:[#allocation13] sm:$0xff]  ;;  %v931_v23 = vpack.c.bf16 %v526_v21, %v525_v20  ;;  %v530_v24 = vld [vmem:[#allocation13 + $0x8] sm:$0xff]  ;;  %v531_v27 = vld [vmem:[#allocation13 + $0x10] sm:$0xff] }
  0x97   :  { %862 = vmatprep.mubr.msk.f32.mxu0 %vm1199_vm0, %v1200_v1  ;;  %920 = vmatpush3.bf16.msra.mxu0 %v919_v25  ;;  %v937_v25 = vpack.c.bf16 %v530_v24, %v529_v22  ;;  %v694_v44 = vld [vmem:[#allocation14 + $0x8] sm:$0xff]  ;;  %v695_v45 = vld [vmem:[#allocation14 + $0x10] sm:$0xff]  ;;  %v801_v7 = vld [vmem:[#allocation14 + $0x20] ss:$0 sm:$0xff] }
  0x98   :  { %921 = vmatprep.subr.bf16.mxu0 %v1198_v0  ;;  %v262_v53 = vrot.slane %v1389_v9, %v261_v51  ;;  %v419_v9 = vld [vmem:[%s1471_s8] sm:$0xff]  ;;  %s1201_s8 = smov [#allocation16]  }
  0x99   :  { %917 = vmatpush3.bf16.msra.mxu1 %v916_v29  ;;  %v532_v29 = vld [vmem:[#allocation13 + $0x18] sm:$0xff]  ;;  %v536_v48 = vrot.slane %v419_v9, %v261_v51  ;;  %s782_s2 = sshll.u32 %s1201_s8, 4  ;;  %s783_s2 = int_to_ptr.vmem [resolvable:$true] %s782_s2 }
  0x9a   :  { %924 = vmatprep.subr.bf16.mxu1 %v1198_v0  ;;  %v940_v30 = vpack.c.bf16 %v532_v29, %v531_v27  ;;  %s1154_s16 = scalar_lea.vmem %s783_s2, 128  ;;  %p1159_p9 = scmp.lt.s32.totalorder %s783_s2, %s783_s2 }
  0x9b   :  { %923 = vmatpush3.bf16.msra.mxu0 %v922_v31  ;;  %p1155_p8 = scmp.ne.s32.totalorder %s783_s2, %s1154_s16  ;;  %p1160_p10 = scmp.lt.s32.totalorder %s1154_s16, %s1154_s16 }
  0x9c   :  { %930 = vmatprep.subr.bf16.mxu0 %v1198_v0 }
  0x9d   :  { %p1161_p11 = por %p1160_p10, %p1159_p9 }
  0x9f   :  { %p1162_p12 = pnand %p1161_p11, %p1155_p8 }
 0x169   :  { %v221_v11 = vpop.f32.mrb[0].mxu0 }
 0x16a   :  { %v222_v12 = vadd.f32 %v221_v11, %v150_v10  ;;  %v842_v13 = vpop.f32.mrb[1].mxu0  ;;  %v427_v10 = vrot.slane %v419_v9, %v149_v8  ;;  %v527_v8 = vld [vmem:[#allocation11 + $0x10] sm:$0xff] }
 0x16b   :  { %v934_v28 = vpack.c.bf16 %v528_v26, %v527_v8 }
 0x16c   :  { %v226_v14 = vsel %vm225_vm2, %v222_v12, 0.0 }
 0x16d   :  { %227 = vadd.xlane.f32.xlu0 %v226_v14 }
 0x1fa   :  { %v228_v15 = vpop.xlane.xlu0 %227 }
 0x1fb   :  { %v230_v16 = vmul.f32 0.03125, %v228_v15 }
 0x1fd   :  { %v231_v17 = vsub.f32 %v222_v12, %v230_v16 }
 0x1ff   :  { %v232_v18 = vmul.f32 %v231_v17, %v231_v17 }
 0x201   :  { %v233_v19 = vsel %vm225_vm2, %v232_v18, 0.0 }
 0x202   :  { %234 = vadd.xlane.f32.xlu0 %v233_v19 }
 0x28f   :  { %v235_v32 = vpop.xlane.xlu0 %234 }
 0x290   :  { %v236_v33 = vmul.f32 0.03125, %v235_v32 }
 0x292   :  { %v237_v34 = vadd.f32 1e-05, %v236_v33 }
 0x294   :  { %962 = vrsqrt.f32 %v237_v34  ;;  %v517_v34 = vrot.slane %v419_v9, %v242_v35  ;;  %v696_v35 = vld [vmem:[#allocation14 + $0x18] sm:$0xff] }
 0x29e   :  { %v963_v38 = vpop.eup %962 }
 0x29f   :  { %v239_v39 = vmul.f32 %v963_v38, %v231_v17 }
 0x2a1   :  { %v244_v41 = vmul.f32 %v243_v37, %v239_v39  ;;  %v522_v39 = vrot.slane %v419_v9, %v247_v36  ;;  %v614_v36 = vrot.slane %v419_v9, %v339_v50 }
 0x2a3   :  { %v249_v42 = vadd.f32 %v248_v40, %v244_v41 }
 0x2a5   :  { %v250_v43 = vmax.f32 %v249_v42, 0.0 }
 0x2a7   :  { %852 = vmatmul.mubr.msk.f32.vlgmr.msra.gmra.mrb[0].mxu1 %vm225_vm2, %v250_v43  ;;  %863 = vmatmul.mubr.msk.f32.vlgmr.msra.gmra.mrb[2].mxu0 %vm225_vm2, %v250_v43  ;;  %v693_v43 = vld [vmem:[#allocation14] sm:$0xff] }
 0x2a8   :  { %873 = vmatprep.mubr.msk.f32.mxu1 %vm1199_vm0, %v1200_v1  ;;  %884 = vmatprep.mubr.msk.f32.mxu0 %vm1199_vm0, %v1200_v1  ;;  %v943_v46 = vpack.c.bf16 %v694_v44, %v693_v43 }
 0x2a9   :  { %926 = vmatpush3.bf16.msra.mxu1 %v925_v47  ;;  %932 = vmatpush3.bf16.msra.mxu0 %v931_v23  ;;  %v946_v47 = vpack.c.bf16 %v696_v35, %v695_v45 }
 0x2aa   :  { %927 = vmatprep.subr.bf16.mxu1 %v1198_v0  ;;  %933 = vmatprep.subr.bf16.mxu0 %v1198_v0 }
 0x2ad   :  { %929 = vmatpush3.bf16.msra.mxu1 %v928_v49  ;;  %935 = vmatpush3.bf16.msra.mxu0 %v934_v28 }
 0x2ae   :  { %936 = vmatprep.subr.bf16.mxu1 %v1198_v0  ;;  %942 = vmatprep.subr.bf16.mxu0 %v1198_v0 }
 0x37a   :  { %v332_v54 = vpop.f32.mrb[0].mxu1  ;;  %v407_v55 = vpop.f32.mrb[2].mxu0 }
 0x37b   :  { %v408_v56 = vadd.f32 %v407_v55, %v340_v52  ;;  %v853_v57 = vpop.f32.mrb[1].mxu1  ;;  %v864_v58 = vpop.f32.mrb[3].mxu0  ;;  %v333_v59 = vadd.f32 %v332_v54, %v262_v53 }
 0x37d   :  { %v411_v60 = vmax.f32 %v408_v56, 0.0  ;;  %964 = vtanh.f32 %v333_v59 }
 0x37f   :  { %v413_v61 = vadd.f32 0.1, %v411_v60 }
 0x381   :  { %v414_v62 = vadd.f32 1e-06, %v413_v61 }
 0x383   :  { %v415_v63 = vmax.f32 %v414_v62, 1e-05 }
 0x385   :  { %966 = vrcp.f32 %v415_v63 }
 0x387   :  { %v965_v2 = vpop.eup %964 }
 0x388   :  { %v412_v3 = vadd.f32 0.1, %v965_v2 }
 0x38f   :  { %v967_v4 = vpop.eup %966 }
 0x390   :  { %v417_v5 = vmul.f32 %v967_v4, %v412_v3 }
 0x392   :  { %968 = vtanh.f32 %v417_v5 }
 0x39c   :  { %v969_v6 = vpop.eup %968 }
 0x39d   :  { %874 = vmatmul.mubr.msk.f32.vlgmr.msra.gmra.mrb[2].mxu1 %vm225_vm2, %v969_v6 }
 0x39e   :  { %895 = vmatprep.mubr.msk.f32.mxu1 %vm1199_vm0, %v1200_v1  ;;  %938 = vmatpush3.bf16.msra.mxu1 %v937_v25 }
 0x39f   :  { %939 = vmatprep.subr.bf16.mxu1 %v1198_v0 }
 0x3a2   :  { %941 = vmatpush3.bf16.msra.mxu1 %v940_v30 }
 0x470   :  { %v497_v11 = vpop.f32.mrb[2].mxu1 }
 0x471   :  { %v498_v12 = vadd.f32 %v497_v11, %v427_v10  ;;  %v875_v13 = vpop.f32.mrb[3].mxu1 }
 0x473   :  { %v501_v14 = vsel %vm225_vm2, %v498_v12, 0.0 }
 0x474   :  { %502 = vadd.xlane.f32.xlu1 %v501_v14 }
 0x501   :  { %v503_v15 = vpop.xlane.xlu1 %502 }
 0x502   :  { %v504_v16 = vmul.f32 0.03125, %v503_v15 }
 0x504   :  { %v505_v17 = vsub.f32 %v498_v12, %v504_v16 }
 0x506   :  { %v506_v18 = vmul.f32 %v505_v17, %v505_v17 }
 0x508   :  { %v507_v19 = vsel %vm225_vm2, %v506_v18, 0.0 }
 0x509   :  { %508 = vadd.xlane.f32.xlu1 %v507_v19 }
 0x596   :  { %v509_v31 = vpop.xlane.xlu1 %508 }
 0x597   :  { %v510_v32 = vmul.f32 0.03125, %v509_v31 }
 0x599   :  { %v511_v33 = vadd.f32 1e-05, %v510_v32 }
 0x59b   :  { %970 = vrsqrt.f32 %v511_v33 }
 0x5a5   :  { %v971_v37 = vpop.eup %970 }
 0x5a6   :  { %v513_v38 = vmul.f32 %v971_v37, %v505_v17 }
 0x5a8   :  { %v518_v40 = vmul.f32 %v517_v34, %v513_v38 }
 0x5aa   :  { %v523_v41 = vadd.f32 %v522_v39, %v518_v40 }
 0x5ac   :  { %v524_v42 = vmax.f32 %v523_v41, 0.0 }
 0x5ae   :  { %885 = vmatmul.mubr.msk.f32.vlgmr.msra.gmra.mrb[4].mxu0 %vm225_vm2, %v524_v42  ;;  %896 = vmatmul.mubr.msk.f32.vlgmr.msra.gmra.mrb[4].mxu1 %vm225_vm2, %v524_v42 }
 0x5af   :  { %906 = vmatprep.mubr.msk.f32.mxu0 %vm1199_vm0, %v1200_v1  ;;  %944 = vmatpush3.bf16.msra.mxu0 %v943_v46 }
 0x5b0   :  { %945 = vmatprep.subr.bf16.mxu0 %v1198_v0 }
 0x5b3   :  { %947 = vmatpush3.bf16.msra.mxu0 %v946_v47 }
 0x681   :  { %v606_v49 = vpop.f32.mrb[4].mxu0  ;;  %v681_v52 = vpop.f32.mrb[4].mxu1 }
 0x682   :  { %v682_v53 = vadd.f32 %v681_v52, %v614_v36  ;;  %v886_v1 = vpop.f32.mrb[5].mxu0  ;;  %v897_v54 = vpop.f32.mrb[5].mxu1  ;;  %v607_v55 = vadd.f32 %v606_v49, %v536_v48 }
 0x684   :  { %v685_v56 = vmax.f32 %v682_v53, 0.0  ;;  %972 = vtanh.f32 %v607_v55 }
 0x686   :  { %v687_v57 = vadd.f32 0.1, %v685_v56 }
 0x688   :  { %v688_v58 = vadd.f32 1e-06, %v687_v57 }
 0x68a   :  { %v689_v59 = vmax.f32 %v688_v58, 1e-05 }
 0x68c   :  { %974 = vrcp.f32 %v689_v59 }
 0x68e   :  { %v973_v0 = vpop.eup %972 }
 0x68f   :  { %v686_v60 = vadd.f32 0.1, %v973_v0 }
 0x696   :  { %v975_v61 = vpop.eup %974 }
 0x697   :  { %v691_v62 = vmul.f32 %v975_v61, %v686_v60 }
 0x699   :  { %976 = vtanh.f32 %v691_v62 }
 0x6a3   :  { %v977_v50 = vpop.eup %976 }
 0x6a4   :  { %907 = vmatmul.mubr.msk.f32.vlgmr.msra.gmra.mrb[6].mxu0 %vm225_vm2, %v977_v50 }
 0x777   :  { %v771_v51 = vpop.f32.mrb[6].mxu0 }
 0x778   :  { %v772_v63 = vadd.f32 %v801_v7, %v771_v51  ;;  %v908_v2 = vpop.f32.mrb[7].mxu0 }
 0x77a   :  { %775 = vst [vmem:[#allocation16] sm:$0xff] %v772_v63 }
 0x77b   :  { %1165 = shalt.err (!%p1162_p12)
}
 0x77c   :  { %s1166_s27 = scalar_lea.hbm %s1473_s10, 128 }
 0x77d   :  { %p1167_p13 = scmp.ne.s32.totalorder %s1473_s10, %s1166_s27  ;;  %p1170_p0 = scmp.lt.u32.totalorder %s1166_s27, %s1473_s10 }
 0x77f   :  { %p1172_p1 = pnand %p1170_p0, %p1167_p13 }
 0x781   :  { %1175 = shalt.err (!%p1172_p1)
}
 0x782   :  { %785 = dma.vmem_to_hbm [thread:$0]  %s783_s2, 128, %s1473_s10, [#allocation4]  }
 0x783   :  { %1186 = dma.done.wait [#allocation4], 128  }
 0x784   :  { %1187 = vsyncadd [#allocation4], 4294967168 }
 0x785   :  { %789 = vsyncpa [#allocation3], 1 }
 0x786   :  { %790 = vsyncpa [#allocation6], 1 }
 0x787   :  { %791 = vsyncpa [#allocation9], 1 }
 0x788   :  { %792 = vsyncpa [#allocation12], 1 }
 0x789   :  { %793 = vsyncpa [#allocation15], 1 }
 0x78a   :  { %794 = vsyncpa [#allocation4], 1 }

</bundles_post_ra>
